<compile_context>
chip_gen: v6e
topology: v6e:2x2x1
jax: 0.10.0
libtpu: 0.0.40
codegen_flags: <defaults>
</compile_context>

<pallas_src>
import numpy as np

import jax
import jax.numpy as jnp
from jax import lax
from jax.experimental import pallas as pl
from jax.experimental.pallas import tpu as pltpu


# --------------------------------------------------------------------------
# Fused kernel: one grid step processes TB batch elements.
# --------------------------------------------------------------------------
def _d_get_logits_kernel(feat_ref, sent_ref, rot_ref,
                         wf_ref, ws_ref, wr_ref, w2_ref, out_ref):
    f32 = jnp.float32
    # conv1 (3x3, SAME, bias=False) as three dense matmuls against pre-folded
    # weights; h[b, p*c_mid + m] == conv1(concat(feat, sent, rot))[b, p, m].
    h = jnp.dot(feat_ref[...], wf_ref[...], preferred_element_type=f32)
    h = h + jnp.dot(sent_ref[...], ws_ref[...], preferred_element_type=f32)
    h = h + jnp.dot(rot_ref[...], wr_ref[...], preferred_element_type=f32)
    # LeakyReLU(0.2)
    h = jnp.maximum(h, 0.2 * h)
    # conv2 (4x4 VALID over the full 4x4 map, cout=1) == weighted reduction
    # over (position, channel); result written lane-major: one (1, TB) row.
    logits = jnp.sum(h * w2_ref[...], axis=-1)            # (TB,)
    out_ref[0, 0, :] = logits


# --------------------------------------------------------------------------
# Wrapper: weight folding + lane-aligned activation plumbing + pallas_call.
# --------------------------------------------------------------------------
def d_get_logits_forward(feat_nhwc, sentence_vec, rot_vec, params, *, tb=None):
    """Pallas forward of D_GET_LOGITS. feat_nhwc: (B, 4, 4, ndf*16) in NHWC."""
    B, H, W, c_feat = feat_nhwc.shape
    HW = H * W
    c_sent = sentence_vec.shape[1]
    c_rot = rot_vec.shape[1]

    w1 = params["w1"].astype(jnp.float32)          # (3, 3, c_feat+c_sent+c_rot, c_mid)
    w2 = params["w2"].astype(jnp.float32)          # (H, W, c_mid, 1)
    kh, kw, c_in, c_mid = w1.shape
    assert c_in == c_feat + c_sent + c_rot
    assert (kh, kw) == (3, 3)
    assert w2.shape == (H, W, c_mid, 1), "conv2 must be full-map VALID with cout == 1"
    n_cols = HW * c_mid                            # 16 * ndf*2 (= 128 for ndf=4)

    # ---- fold the 3x3 SAME spatial structure into the weights (trace-time) ----
    # S[p, s, ty, tx] = 1 iff source position s feeds output position p via tap (ty,tx)
    S = np.zeros((HW, HW, kh, kw), np.float32)
    for py in range(H):
        for px in range(W):
            for ty in range(kh):
                for tx in range(kw):
                    sy, sx = py + ty - 1, px + tx - 1
                    if 0 <= sy < H and 0 <= sx < W:
                        S[py * W + px, sy * W + sx, ty, tx] = 1.0
    T = S.sum(axis=1)                              # (HW, 3, 3): in-bounds taps per pos

    w1_feat = w1[:, :, :c_feat, :]
    w1_sent = w1[:, :, c_feat:c_feat + c_sent, :]
    w1_rot = w1[:, :, c_feat + c_sent:, :]

    # feat: full conv structure folded -> (HW*c_feat, HW*c_mid)
    wf = jnp.einsum('psij,ijcm->scpm', S, w1_feat,
                    precision=lax.Precision.HIGHEST).reshape(HW * c_feat, n_cols)
    # spatially-constant channels: only the per-position tap mask matters
    ws = jnp.einsum('pij,ijcm->cpm', T, w1_sent,
                    precision=lax.Precision.HIGHEST).reshape(c_sent, n_cols)
    wr = jnp.einsum('pij,ijcm->cpm', T, w1_rot,
                    precision=lax.Precision.HIGHEST).reshape(c_rot, n_cols)
    c_rotp = ((max(c_rot, 128) + 127) // 128) * 128                 # 72 -> 128 lanes
    wr = jnp.pad(wr, ((0, c_rotp - c_rot), (0, 0)))
    w2row = w2[..., 0].reshape(1, n_cols)                           # (1, HW*c_mid)

    # ---- activations: lane-aligned, batch-tiled ----
    if tb is None:
        tb = min(128, ((B + 7) // 8) * 8)          # fill MXU rows, stay VMEM-friendly
    b_pad = ((B + tb - 1) // tb) * tb
    n_steps = b_pad // tb
    # TODO(synk): with huge B on v7x, cap tb so (n_steps is even) to balance megacore.

    feat_flat = feat_nhwc.astype(jnp.float32).reshape(B, HW * c_feat)
    sent = sentence_vec.astype(jnp.float32)
    rot = jnp.pad(rot_vec.astype(jnp.float32), ((0, 0), (0, c_rotp - c_rot)))
    if b_pad != B:
        pad = ((0, b_pad - B), (0, 0))
        feat_flat = jnp.pad(feat_flat, pad)
        sent = jnp.pad(sent, pad)
        rot = jnp.pad(rot, pad)

    cost = pl.CostEstimate(
        flops=2 * b_pad * (HW * c_feat + c_sent + c_rotp + 1) * n_cols,
        transcendentals=0,
        bytes_accessed=int(4 * (feat_flat.size + sent.size + rot.size
                                + wf.size + ws.size + wr.size + w2row.size + b_pad)))

    out = pl.pallas_call(
        _d_get_logits_kernel,
        out_shape=jax.ShapeDtypeStruct((n_steps, 1, tb), jnp.float32),
        grid=(n_steps,),
        in_specs=[
            pl.BlockSpec((tb, HW * c_feat), lambda i: (i, 0)),
            pl.BlockSpec((tb, c_sent), lambda i: (i, 0)),
            pl.BlockSpec((tb, c_rotp), lambda i: (i, 0)),
            pl.BlockSpec((HW * c_feat, n_cols), lambda i: (0, 0)),  # weights resident
            pl.BlockSpec((c_sent, n_cols), lambda i: (0, 0)),
            pl.BlockSpec((c_rotp, n_cols), lambda i: (0, 0)),
            pl.BlockSpec((1, n_cols), lambda i: (0, 0)),
        ],
        out_specs=pl.BlockSpec((1, 1, tb), lambda i: (i, 0, 0)),
        compiler_params=pltpu.CompilerParams(
            dimension_semantics=("parallel",)),     # v7x: batch steps across 2 TCs
        cost_estimate=cost,
    )(feat_flat, sent, rot, wf, ws, wr, w2row)

    return out.reshape(-1)[:B].reshape(B, 1, 1, 1)


# --------------------------------------------------------------------------
# Pure-JAX reference (for correctness checking)
# --------------------------------------------------------------------------
def reference(feat_nhwc, sentence_vec, rot_vec, params):
    B, H, W, _ = feat_nhwc.shape
    sv_map = jnp.broadcast_to(sentence_vec[:, None, None, :],
                              (B, H, W, sentence_vec.shape[1]))
    rot_map = jnp.broadcast_to(rot_vec[:, None, None, :],
                               (B, H, W, rot_vec.shape[1]))
    h = jnp.concatenate([feat_nhwc, sv_map, rot_map], axis=-1)
    h = lax.conv_general_dilated(h, params["w1"], (1, 1), "SAME",
                                 dimension_numbers=("NHWC", "HWIO", "NHWC"),
                                 precision=lax.Precision.HIGHEST)
    h = jnp.where(h > 0, h, 0.2 * h)
    o = lax.conv_general_dilated(h, params["w2"], (1, 1), "VALID",
                                 dimension_numbers=("NHWC", "HWIO", "NHWC"),
                                 precision=lax.Precision.HIGHEST)
    return o  # (B, 1, 1, 1)


if __name__ == "__main__":
    ndf = 4
    B, H, W = 2, 4, 4
    c_feat = ndf * 16          # 64   (torch `out` is NCHW (2, 64, 4, 4); here NHWC)
    c_sent = 256
    c_rot = 24 * 3             # 72
    c_mid = ndf * 2            # 8

    key = jax.random.PRNGKey(0)
    kf, ks, kr, k1, k2 = jax.random.split(key, 5)
    feat = jax.random.normal(kf, (B, H, W, c_feat), jnp.float32)
    sent = jax.random.normal(ks, (B, c_sent), jnp.float32)
    rot = jax.random.normal(kr, (B, c_rot), jnp.float32)
    params = dict(
        w1=0.05 * jax.random.normal(k1, (3, 3, c_feat + c_sent + c_rot, c_mid),
                                    jnp.float32),
        w2=0.05 * jax.random.normal(k2, (4, 4, c_mid, 1), jnp.float32),
    )

    out = d_get_logits_forward(feat, sent, rot, params)
    out = jax.block_until_ready(out)

    ref = reference(feat, sent, rot, params)
    assert out.shape == (B, 1, 1, 1)
    err = float(jnp.max(jnp.abs(out - ref)))
    assert jnp.allclose(out, ref, rtol=1e-3, atol=1e-3), f"max abs err {err}"
    print("KERNEL_OK")
</pallas_src>

<mosaic_0001>
module attributes {stable_mosaic.version = 11 : i64} {
  func.func @_d_get_logits_kernel(%arg0: i32, %arg1: memref<8x1024xf32, #tpu.memory_space<vmem>>, %arg2: memref<8x256xf32, #tpu.memory_space<vmem>>, %arg3: memref<8x128xf32, #tpu.memory_space<vmem>>, %arg4: memref<1024x128xf32, #tpu.memory_space<vmem>>, %arg5: memref<256x128xf32, #tpu.memory_space<vmem>>, %arg6: memref<128x128xf32, #tpu.memory_space<vmem>>, %arg7: memref<1x128xf32, #tpu.memory_space<vmem>>, %arg8: memref<1x1x8xf32, #tpu.memory_space<vmem>>) attributes {dimension_semantics = [#tpu.dimension_semantics<parallel>], iteration_bounds = array<i64: 1>, scalar_prefetch = 0 : i64, scratch_operands = 0 : i64, tpu.core_type = #tpu.core_type<tc>, window_params = [{transform_indices = @transform_0, window_bounds = array<i64: 8, 1024>}, {transform_indices = @transform_1, window_bounds = array<i64: 8, 256>}, {transform_indices = @transform_2, window_bounds = array<i64: 8, 128>}, {pipeline_mode = #tpu.pipeline_mode<synchronous>, transform_indices = @transform_3, window_bounds = array<i64: 1024, 128>}, {pipeline_mode = #tpu.pipeline_mode<synchronous>, transform_indices = @transform_4, window_bounds = array<i64: 256, 128>}, {pipeline_mode = #tpu.pipeline_mode<synchronous>, transform_indices = @transform_5, window_bounds = array<i64: 128, 128>}, {pipeline_mode = #tpu.pipeline_mode<synchronous>, transform_indices = @transform_6, window_bounds = array<i64: 1, 128>}, {transform_indices = @transform_7, window_bounds = array<i64: 1, 1, 8>}]} {
    %c0 = arith.constant 0 : index
    %c0_0 = arith.constant 0 : index
    %0 = vector.load %arg1[%c0, %c0_0] : memref<8x1024xf32, #tpu.memory_space<vmem>>, vector<8x1024xf32>
    %c0_1 = arith.constant 0 : index
    %c0_2 = arith.constant 0 : index
    %1 = vector.load %arg4[%c0_1, %c0_2] : memref<1024x128xf32, #tpu.memory_space<vmem>>, vector<1024x128xf32>
    %cst = arith.constant dense<0.000000e+00> : vector<8x128xf32>
    %2 = tpu.matmul %0, %1, %cst {dimension_numbers = #tpu.dot_dimension_numbers<[1], [0], [0], [1], [0, 0, 1, 1], [], []>} : vector<8x1024xf32>, vector<1024x128xf32>, vector<8x128xf32> -> vector<8x128xf32>
    %c0_3 = arith.constant 0 : index
    %c0_4 = arith.constant 0 : index
    %3 = vector.load %arg2[%c0_3, %c0_4] : memref<8x256xf32, #tpu.memory_space<vmem>>, vector<8x256xf32>
    %c0_5 = arith.constant 0 : index
    %c0_6 = arith.constant 0 : index
    %4 = vector.load %arg5[%c0_5, %c0_6] : memref<256x128xf32, #tpu.memory_space<vmem>>, vector<256x128xf32>
    %cst_7 = arith.constant dense<0.000000e+00> : vector<8x128xf32>
    %5 = tpu.matmul %3, %4, %cst_7 {dimension_numbers = #tpu.dot_dimension_numbers<[1], [0], [0], [1], [0, 0, 1, 1], [], []>} : vector<8x256xf32>, vector<256x128xf32>, vector<8x128xf32> -> vector<8x128xf32>
    %6 = arith.addf %2, %5 : vector<8x128xf32>
    %c0_8 = arith.constant 0 : index
    %c0_9 = arith.constant 0 : index
    %7 = vector.load %arg3[%c0_8, %c0_9] : memref<8x128xf32, #tpu.memory_space<vmem>>, vector<8x128xf32>
    %c0_10 = arith.constant 0 : index
    %c0_11 = arith.constant 0 : index
    %8 = vector.load %arg6[%c0_10, %c0_11] : memref<128x128xf32, #tpu.memory_space<vmem>>, vector<128x128xf32>
    %cst_12 = arith.constant dense<0.000000e+00> : vector<8x128xf32>
    %9 = tpu.matmul %7, %8, %cst_12 {dimension_numbers = #tpu.dot_dimension_numbers<[1], [0], [0], [1], [0, 0, 1, 1], [], []>} : vector<8x128xf32>, vector<128x128xf32>, vector<8x128xf32> -> vector<8x128xf32>
    %10 = arith.addf %6, %9 : vector<8x128xf32>
    %cst_13 = arith.constant 2.000000e-01 : f32
    %11 = vector.broadcast %cst_13 : f32 to vector<8x128xf32>
    %12 = arith.mulf %11, %10 : vector<8x128xf32>
    %13 = arith.maximumf %10, %12 : vector<8x128xf32>
    %c0_14 = arith.constant 0 : index
    %c0_15 = arith.constant 0 : index
    %14 = vector.load %arg7[%c0_14, %c0_15] : memref<1x128xf32, #tpu.memory_space<vmem>>, vector<1x128xf32>
    %15 = vector.broadcast %14 : vector<1x128xf32> to vector<8x128xf32>
    %16 = arith.mulf %13, %15 : vector<8x128xf32>
    %cst_16 = arith.constant dense<0.000000e+00> : vector<8xf32>
    %17 = vector.multi_reduction <add>, %16, %cst_16 [1] : vector<8x128xf32> to vector<8xf32>
    %c0_17 = arith.constant 0 : index
    %c0_18 = arith.constant 0 : index
    %c0_19 = arith.constant 0 : index
    %18 = vector.load %arg8[%c0_17, %c0_18, %c0_19] : memref<1x1x8xf32, #tpu.memory_space<vmem>>, vector<1x1x8xf32>
    %19 = vector.shape_cast %18 : vector<1x1x8xf32> to vector<8xf32>
    %20 = vector.shape_cast %17 : vector<8xf32> to vector<1x1x8xf32>
    tpu.vector_store %arg8[%c0_17, %c0_18, %c0_19], %20 {strides = array<i32>} : memref<1x1x8xf32, #tpu.memory_space<vmem>>, vector<1x1x8xf32>,
    return
  }
  func.func @transform_0(%arg0: i32) -> (i32, i32) {
    %c0_i32 = arith.constant 0 : i32
    %c0_i32_0 = arith.constant 0 : i32
    return %arg0, %c0_i32 : i32, i32
  }
  func.func @transform_1(%arg0: i32) -> (i32, i32) {
    %c0_i32 = arith.constant 0 : i32
    %c0_i32_0 = arith.constant 0 : i32
    return %arg0, %c0_i32 : i32, i32
  }
  func.func @transform_2(%arg0: i32) -> (i32, i32) {
    %c0_i32 = arith.constant 0 : i32
    %c0_i32_0 = arith.constant 0 : i32
    return %arg0, %c0_i32 : i32, i32
  }
  func.func @transform_3(%arg0: i32) -> (i32, i32) {
    %c0_i32 = arith.constant 0 : i32
    %c0_i32_0 = arith.constant 0 : i32
    %c0_i32_1 = arith.constant 0 : i32
    return %c0_i32, %c0_i32_0 : i32, i32
  }
  func.func @transform_4(%arg0: i32) -> (i32, i32) {
    %c0_i32 = arith.constant 0 : i32
    %c0_i32_0 = arith.constant 0 : i32
    %c0_i32_1 = arith.constant 0 : i32
    return %c0_i32, %c0_i32_0 : i32, i32
  }
  func.func @transform_5(%arg0: i32) -> (i32, i32) {
    %c0_i32 = arith.constant 0 : i32
    %c0_i32_0 = arith.constant 0 : i32
    %c0_i32_1 = arith.constant 0 : i32
    return %c0_i32, %c0_i32_0 : i32, i32
  }
  func.func @transform_6(%arg0: i32) -> (i32, i32) {
    %c0_i32 = arith.constant 0 : i32
    %c0_i32_0 = arith.constant 0 : i32
    %c0_i32_1 = arith.constant 0 : i32
    return %c0_i32, %c0_i32_0 : i32, i32
  }
  func.func @transform_7(%arg0: i32) -> (i32, i32, i32) {
    %c0_i32 = arith.constant 0 : i32
    %c0_i32_0 = arith.constant 0 : i32
    %c0_i32_1 = arith.constant 0 : i32
    return %arg0, %c0_i32, %c0_i32_0 : i32, i32, i32
  }
}

</mosaic_0001>

<bundles_post_ra>
// kernel: tpu_custom_call.1
= control target key start
LH: loop header
LB: loop body
LE: loop exit
PB: predicated region body
PF: predicated region fallthrough
CT: control target
= control target key end

     0   :  { %12 = vsyncpa [#allocation3], 0  ;;  %s1241_s0 = inlined_call_operand.hbm [shape: f32[8,1024], index: 0, kind: input, shape index: {}]   ;;  %s1242_s1 = inlined_call_operand.hbm [shape: f32[8,256], index: 1, kind: input, shape index: {}]   ;;  %s1243_s2 = inlined_call_operand.hbm [shape: f32[8,128], index: 2, kind: input, shape index: {}]   ;;  %s1244_s3 = inlined_call_operand.hbm [shape: f32[1024,128], index: 3, kind: input, shape index: {}]   ;;  %s1245_s4 = inlined_call_operand.hbm [shape: f32[256,128], index: 4, kind: input, shape index: {}]   ;;  %s1246_s5 = inlined_call_operand.hbm [shape: f32[128,128], index: 5, kind: input, shape index: {}]   ;;  %s1247_s6 = inlined_call_operand.vmem [shape: f32[1,128], index: 6, kind: input, shape index: {}]   ;;  %s1248_s7 = inlined_call_operand.hbm [shape: f32[1,1,8], index: 7, kind: output, shape index: {}]  }
   0x1   :  { %13 = vsyncpa [#allocation6], 0 }
   0x2   :  { %14 = vsyncpa [#allocation9], 0 }
   0x3   :  { %15 = vsyncpa [#allocation12], 0 }
   0x4   :  { %16 = vsyncpa [#allocation4], 0  ;;  %s1140_s24 = smov [#allocation5]   ;;  %s1141_s26 = smov [#allocation8]  }
   0x5   :  { %s33_s25 = sshll.u32 %s1140_s24, 4  ;;  %s52_s27 = sshll.u32 %s1141_s26, 4  ;;  %s34_s25 = int_to_ptr.vmem [resolvable:$true] %s33_s25  ;;  %s53_s27 = int_to_ptr.vmem [resolvable:$true] %s52_s27 }
   0x6   :  { %s998_s28 = scalar_lea.vmem %s34_s25, 256  ;;  %p1003_p1 = scmp.lt.s32.totalorder %s34_s25, %s34_s25 }
   0x7   :  { %p999_p0 = scmp.ne.s32.totalorder %s34_s25, %s998_s28  ;;  %p1004_p2 = scmp.lt.s32.totalorder %s998_s28, %s998_s28 }
   0x9   :  { %p1005_p3 = por %p1004_p2, %p1003_p1 }
   0xb   :  { %p1006_p4 = pnand %p1005_p3, %p999_p0 }
   0xd   :  { %1009 = shalt.err (!%p1006_p4)
}
   0xe   :  { %36 = dma.hbm_to_vmem [thread:$0]  %s1242_s1, 256, %s34_s25, [#allocation6]  }
   0xf   :  { %s1018_s8 = scalar_lea.vmem %s53_s27, 16384  ;;  %p1023_p6 = scmp.lt.s32.totalorder %s53_s27, %s53_s27 }
  0x10   :  { %p1019_p5 = scmp.ne.s32.totalorder %s53_s27, %s1018_s8  ;;  %p1024_p7 = scmp.lt.s32.totalorder %s1018_s8, %s1018_s8 }
  0x12   :  { %p1025_p8 = por %p1024_p7, %p1023_p6 }
  0x14   :  { %p1026_p9 = pnand %p1025_p8, %p1019_p5 }
  0x16   :  { %1029 = shalt.err (!%p1026_p9)
}
  0x17   :  { %s1142_s9 = smov 128   ;;  %s1143_s10 = smov 8  }
  0x18   :  { %58 = dma.hbm_to_vmem [thread:$0]  %s1244_s3, 16384, %s53_s27, [#allocation9], %s1142_s9, %s1142_s9, %s1143_s10  }
  0x19   :  { %s1144_s13 = smov [#allocation2]   ;;  %s1145_s15 = smov [#allocation7]  }
  0x1a   :  { %s23_s14 = sshll.u32 %s1144_s13, 4  ;;  %s43_s1 = sshll.u32 %s1145_s15, 4  ;;  %s24_s14 = int_to_ptr.vmem [resolvable:$true] %s23_s14  ;;  %s44_s1 = int_to_ptr.vmem [resolvable:$true] %s43_s1 }
  0x1b   :  { %s1038_s16 = scalar_lea.vmem %s24_s14, 1024  ;;  %p1043_p11 = scmp.lt.s32.totalorder %s24_s14, %s24_s14 }
  0x1c   :  { %p1039_p10 = scmp.ne.s32.totalorder %s24_s14, %s1038_s16  ;;  %p1044_p12 = scmp.lt.s32.totalorder %s1038_s16, %s1038_s16 }
  0x1e   :  { %p1045_p13 = por %p1044_p12, %p1043_p11 }
  0x20   :  { %p1046_p0 = pnand %p1045_p13, %p1039_p10 }
  0x22   :  { %1049 = shalt.err (!%p1046_p0)
}
  0x23   :  { %26 = dma.hbm_to_vmem [thread:$0]  %s1241_s0, 1024, %s24_s14, [#allocation3]  }
  0x24   :  { %s1058_s19 = scalar_lea.vmem %s44_s1, 128  ;;  %p1063_p2 = scmp.lt.s32.totalorder %s44_s1, %s44_s1 }
  0x25   :  { %p1059_p1 = scmp.ne.s32.totalorder %s44_s1, %s1058_s19  ;;  %p1064_p3 = scmp.lt.s32.totalorder %s1058_s19, %s1058_s19 }
  0x27   :  { %p1065_p4 = por %p1064_p3, %p1063_p2 }
  0x29   :  { %p1066_p5 = pnand %p1065_p4, %p1059_p1 }
  0x2b   :  { %1069 = shalt.err (!%p1066_p5)
}
  0x2c   :  { %46 = dma.hbm_to_vmem [thread:$0]  %s1243_s2, 128, %s44_s1, [#allocation6]  }
  0x2d   :  { %s1146_s21 = smov [#allocation10]   ;;  %s1147_s23 = smov [#allocation11]  }
  0x2e   :  { %s64_s22 = sshll.u32 %s1146_s21, 4  ;;  %s76_s24 = sshll.u32 %s1147_s23, 4  ;;  %s65_s22 = int_to_ptr.vmem [resolvable:$true] %s64_s22  ;;  %s77_s24 = int_to_ptr.vmem [resolvable:$true] %s76_s24 }
  0x2f   :  { %s1078_s25 = scalar_lea.vmem %s65_s22, 4096  ;;  %p1083_p7 = scmp.lt.s32.totalorder %s65_s22, %s65_s22 }
  0x30   :  { %p1079_p6 = scmp.ne.s32.totalorder %s65_s22, %s1078_s25  ;;  %p1084_p8 = scmp.lt.s32.totalorder %s1078_s25, %s1078_s25 }
  0x32   :  { %p1085_p9 = por %p1084_p8, %p1083_p7 }
  0x34   :  { %p1086_p10 = pnand %p1085_p9, %p1079_p6 }
  0x36   :  { %1089 = shalt.err (!%p1086_p10)
}
  0x37   :  { %70 = dma.hbm_to_vmem [thread:$0]  %s1245_s4, 4096, %s65_s22, [#allocation9], %s1142_s9, %s1142_s9, %s1143_s10  }
  0x38   :  { %s1098_s2 = scalar_lea.vmem %s77_s24, 2048  ;;  %p1103_p12 = scmp.lt.s32.totalorder %s77_s24, %s77_s24 }
  0x39   :  { %p1099_p11 = scmp.ne.s32.totalorder %s77_s24, %s1098_s2  ;;  %p1104_p13 = scmp.lt.s32.totalorder %s1098_s2, %s1098_s2 }
  0x3b   :  { %p1105_p0 = por %p1104_p13, %p1103_p12 }
  0x3d   :  { %p1106_p1 = pnand %p1105_p0, %p1099_p11 }
  0x3f   :  { %1109 = shalt.err (!%p1106_p1)
}
  0x40   :  { %82 = dma.hbm_to_vmem [thread:$0]  %s1246_s5, 2048, %s77_s24, [#allocation12], %s1142_s9, %s1142_s9, %s1143_s10  }
  0x41   :  { %1130 = dma.done.wait [#allocation3], 1024  }
  0x42   :  { %1131 = vsyncadd [#allocation3], 4294966272 }
  0x43   :  { %1132 = dma.done.wait [#allocation6], 384  }
  0x44   :  { %1133 = vsyncadd [#allocation6], 4294966912 }
  0x45   :  { %1134 = dma.done.wait [#allocation9], 20480  }
  0x46   :  { %1135 = vsyncadd [#allocation9], 4294946816 }
  0x47   :  { %1136 = dma.done.wait [#allocation12], 2048  }
  0x48   :  { %1137 = vsyncadd [#allocation12], 4294965248  ;;  %v272_v0 = vld [vmem:[#allocation10 + $0xf8] sm:$0xff]  ;;  %v271_v4 = vld [vmem:[#allocation10 + $0xf0] sm:$0xff]  ;;  %vm1149_vm0 = vmmov 0   ;;  %s1150_s29 = smov [#allocation13]  }
  0x49   :  { %v142_v1 = vld [vmem:[#allocation8 + $0xf8] sm:$0xff]  ;;  %752 = vmatprep.subr.mxu0 %v272_v0  ;;  %v141_v5 = vld [vmem:[#allocation8 + $0xf0] sm:$0xff]  ;;  %v270_v8 = vld [vmem:[#allocation10 + $0xe8] sm:$0xff]  ;;  %s739_s30 = sshll.u32 %s1150_s29, 4  ;;  %vm731_vm1 = vcmask 57344   ;;  %s740_s30 = int_to_ptr.vmem [resolvable:$true] %s739_s30 }
  0x4a   :  { %v256_v2 = vld [vmem:[#allocation10 + $0x78] sm:$0xff]  ;;  %787 = vmatprep.subr.mxu1 %v142_v1  ;;  %v255_v6 = vld [vmem:[#allocation10 + $0x70] sm:$0xff]  ;;  %v140_v9 = vld [vmem:[#allocation8 + $0xe8] sm:$0xff]  ;;  %s1110_s8 = scalar_lea.vmem %s740_s30, 16  ;;  %s1114_s9 = scalar_lea.vmem %s740_s30, 32 }
  0x4b   :  { %v126_v3 = vld [vmem:[#allocation8 + $0x78] sm:$0xff]  ;;  %753 = vmatpush3.msra.mxu0 %v256_v2  ;;  %v125_v7 = vld [vmem:[#allocation8 + $0x70] sm:$0xff]  ;;  %v254_v10 = vld [vmem:[#allocation10 + $0x68] sm:$0xff]  ;;  %p1111_p2 = scmp.ne.s32.totalorder %s740_s30, %s1110_s8  ;;  %p1115_p3 = scmp.lt.s32.totalorder %s740_s30, %s740_s30 }
  0x4c   :  { %788 = vmatpush3.msra.mxu1 %v126_v3  ;;  %754 = vmatprep.subr.mxu0 %v271_v4  ;;  %v124_v11 = vld [vmem:[#allocation8 + $0x68] sm:$0xff]  ;;  %v269_v12 = vld [vmem:[#allocation10 + $0xe0] sm:$0xff]  ;;  %v268_v16 = vld [vmem:[#allocation10 + $0xd8] sm:$0xff]  ;;  %p1116_p4 = scmp.lt.s32.totalorder %s1114_s9, %s1110_s8 }
  0x4d   :  { %789 = vmatprep.subr.mxu1 %v141_v5  ;;  %755 = vmatpush3.msra.mxu0 %v255_v6  ;;  %v139_v13 = vld [vmem:[#allocation8 + $0xe0] sm:$0xff]  ;;  %v138_v17 = vld [vmem:[#allocation8 + $0xd8] sm:$0xff]  ;;  %v267_v20 = vld [vmem:[#allocation10 + $0xd0] sm:$0xff] }
  0x4e   :  { %790 = vmatpush3.msra.mxu1 %v125_v7  ;;  %756 = vmatprep.subr.mxu0 %v270_v8  ;;  %v253_v14 = vld [vmem:[#allocation10 + $0x60] sm:$0xff]  ;;  %v252_v18 = vld [vmem:[#allocation10 + $0x58] sm:$0xff]  ;;  %v137_v21 = vld [vmem:[#allocation8 + $0xd0] sm:$0xff]  ;;  %p1117_p5 = por %p1116_p4, %p1115_p3 }
  0x4f   :  { %791 = vmatprep.subr.mxu1 %v140_v9  ;;  %v123_v15 = vld [vmem:[#allocation8 + $0x60] sm:$0xff]  ;;  %757 = vmatpush3.msra.mxu0 %v254_v10  ;;  %v122_v19 = vld [vmem:[#allocation8 + $0x58] sm:$0xff]  ;;  %v251_v22 = vld [vmem:[#allocation10 + $0x50] sm:$0xff] }
  0x50   :  { %792 = vmatpush3.msra.mxu1 %v124_v11  ;;  %758 = vmatprep.subr.mxu0 %v269_v12  ;;  %v121_v23 = vld [vmem:[#allocation8 + $0x50] sm:$0xff]  ;;  %v266_v24 = vld [vmem:[#allocation10 + $0xc8] sm:$0xff]  ;;  %v265_v28 = vld [vmem:[#allocation10 + $0xc0] sm:$0xff]  ;;  %p1118_p6 = pnand %p1117_p5, %p1111_p2 }
  0x51   :  { %793 = vmatprep.subr.mxu1 %v139_v13  ;;  %759 = vmatpush3.msra.mxu0 %v253_v14  ;;  %v136_v25 = vld [vmem:[#allocation8 + $0xc8] sm:$0xff]  ;;  %v135_v29 = vld [vmem:[#allocation8 + $0xc0] sm:$0xff]  ;;  %v264_v32 = vld [vmem:[#allocation10 + $0xb8] sm:$0xff] }
  0x52   :  { %794 = vmatpush3.msra.mxu1 %v123_v15  ;;  %760 = vmatprep.subr.mxu0 %v268_v16  ;;  %v250_v26 = vld [vmem:[#allocation10 + $0x48] sm:$0xff]  ;;  %v249_v30 = vld [vmem:[#allocation10 + $0x40] sm:$0xff]  ;;  %v134_v33 = vld [vmem:[#allocation8 + $0xb8] sm:$0xff] }
  0x53   :  { %795 = vmatprep.subr.mxu1 %v138_v17  ;;  %761 = vmatpush3.msra.mxu0 %v252_v18  ;;  %v120_v27 = vld [vmem:[#allocation8 + $0x48] sm:$0xff]  ;;  %v119_v31 = vld [vmem:[#allocation8 + $0x40] sm:$0xff]  ;;  %v248_v34 = vld [vmem:[#allocation10 + $0x38] sm:$0xff] }
  0x54   :  { %796 = vmatpush3.msra.mxu1 %v122_v19  ;;  %762 = vmatprep.subr.mxu0 %v267_v20  ;;  %v118_v35 = vld [vmem:[#allocation8 + $0x38] sm:$0xff]  ;;  %v263_v36 = vld [vmem:[#allocation10 + $0xb0] sm:$0xff]  ;;  %v262_v40 = vld [vmem:[#allocation10 + $0xa8] sm:$0xff] }
  0x55   :  { %797 = vmatprep.subr.mxu1 %v137_v21  ;;  %763 = vmatpush3.msra.mxu0 %v251_v22  ;;  %v133_v37 = vld [vmem:[#allocation8 + $0xb0] sm:$0xff]  ;;  %v132_v41 = vld [vmem:[#allocation8 + $0xa8] sm:$0xff]  ;;  %v261_v44 = vld [vmem:[#allocation10 + $0xa0] sm:$0xff] }
  0x56   :  { %798 = vmatpush3.msra.mxu1 %v121_v23  ;;  %764 = vmatprep.subr.mxu0 %v266_v24  ;;  %v247_v38 = vld [vmem:[#allocation10 + $0x30] sm:$0xff]  ;;  %v246_v42 = vld [vmem:[#allocation10 + $0x28] sm:$0xff]  ;;  %v131_v45 = vld [vmem:[#allocation8 + $0xa0] sm:$0xff] }
  0x57   :  { %799 = vmatprep.subr.mxu1 %v136_v25  ;;  %765 = vmatpush3.msra.mxu0 %v250_v26  ;;  %v117_v39 = vld [vmem:[#allocation8 + $0x30] sm:$0xff]  ;;  %v116_v43 = vld [vmem:[#allocation8 + $0x28] sm:$0xff]  ;;  %v245_v46 = vld [vmem:[#allocation10 + $0x20] sm:$0xff] }
  0x58   :  { %800 = vmatpush3.msra.mxu1 %v120_v27  ;;  %766 = vmatprep.subr.mxu0 %v265_v28  ;;  %v115_v47 = vld [vmem:[#allocation8 + $0x20] sm:$0xff]  ;;  %v260_v48 = vld [vmem:[#allocation10 + $0x98] sm:$0xff]  ;;  %v259_v52 = vld [vmem:[#allocation10 + $0x90] sm:$0xff] }
  0x59   :  { %801 = vmatprep.subr.mxu1 %v135_v29  ;;  %767 = vmatpush3.msra.mxu0 %v249_v30  ;;  %v130_v49 = vld [vmem:[#allocation8 + $0x98] sm:$0xff]  ;;  %v129_v53 = vld [vmem:[#allocation8 + $0x90] sm:$0xff]  ;;  %v258_v56 = vld [vmem:[#allocation10 + $0x88] sm:$0xff] }
  0x5a   :  { %802 = vmatpush3.msra.mxu1 %v119_v31  ;;  %768 = vmatprep.subr.mxu0 %v264_v32  ;;  %v244_v50 = vld [vmem:[#allocation10 + $0x18] sm:$0xff]  ;;  %v243_v54 = vld [vmem:[#allocation10 + $0x10] sm:$0xff]  ;;  %v128_v57 = vld [vmem:[#allocation8 + $0x88] sm:$0xff] }
  0x5b   :  { %803 = vmatprep.subr.mxu1 %v134_v33  ;;  %769 = vmatpush3.msra.mxu0 %v248_v34  ;;  %v114_v51 = vld [vmem:[#allocation8 + $0x18] sm:$0xff]  ;;  %v113_v55 = vld [vmem:[#allocation8 + $0x10] sm:$0xff]  ;;  %v242_v58 = vld [vmem:[#allocation10 + $0x8] sm:$0xff] }
  0x5c   :  { %804 = vmatpush3.msra.mxu1 %v118_v35  ;;  %770 = vmatprep.subr.mxu0 %v263_v36  ;;  %v112_v59 = vld [vmem:[#allocation8 + $0x8] sm:$0xff]  ;;  %v257_v60 = vld [vmem:[#allocation10 + $0x80] sm:$0xff]  ;;  %v240_v63 = vld [vmem:[#allocation5 + $0x8] sm:$0xff] }
  0x5d   :  { %805 = vmatprep.subr.mxu1 %v133_v37  ;;  %771 = vmatpush3.msra.mxu0 %v247_v38  ;;  %v127_v61 = vld [vmem:[#allocation8 + $0x80] sm:$0xff]  ;;  %v104_v1 = vld [vmem:[#allocation2 + $0x8] sm:$0xff]  ;;  %v239_v2 = vld [vmem:[#allocation5] sm:$0xff] }
  0x5e   :  { %806 = vmatpush3.msra.mxu1 %v117_v39  ;;  %772 = vmatprep.subr.mxu0 %v262_v40  ;;  %v241_v62 = vld [vmem:[#allocation10] sm:$0xff]  ;;  %v103_v3 = vld [vmem:[#allocation2] sm:$0xff]  ;;  %v174_v4 = vld [vmem:[#allocation8 + $0x1f8] sm:$0xff] }
  0x5f   :  { %807 = vmatprep.subr.mxu1 %v132_v41  ;;  %773 = vmatpush3.msra.mxu0 %v246_v42  ;;  %v111_v0 = vld [vmem:[#allocation8] sm:$0xff]  ;;  %v206_v5 = vld [vmem:[#allocation8 + $0x2f8] sm:$0xff]  ;;  %v173_v8 = vld [vmem:[#allocation8 + $0x1f0] sm:$0xff] }
  0x60   :  { %808 = vmatpush3.msra.mxu1 %v116_v43  ;;  %774 = vmatprep.subr.mxu0 %v261_v44  ;;  %v158_v6 = vld [vmem:[#allocation8 + $0x178] sm:$0xff]  ;;  %v205_v9 = vld [vmem:[#allocation8 + $0x2f0] sm:$0xff]  ;;  %v172_v12 = vld [vmem:[#allocation8 + $0x1e8] sm:$0xff] }
  0x61   :  { %809 = vmatprep.subr.mxu1 %v131_v45  ;;  %775 = vmatpush3.msra.mxu0 %v245_v46  ;;  %v190_v7 = vld [vmem:[#allocation8 + $0x278] sm:$0xff]  ;;  %v157_v10 = vld [vmem:[#allocation8 + $0x170] sm:$0xff]  ;;  %v204_v13 = vld [vmem:[#allocation8 + $0x2e8] sm:$0xff] }
  0x62   :  { %810 = vmatpush3.msra.mxu1 %v115_v47  ;;  %776 = vmatprep.subr.mxu0 %v260_v48  ;;  %v189_v11 = vld [vmem:[#allocation8 + $0x270] sm:$0xff]  ;;  %v156_v14 = vld [vmem:[#allocation8 + $0x168] sm:$0xff]  ;;  %v171_v16 = vld [vmem:[#allocation8 + $0x1e0] sm:$0xff] }
  0x63   :  { %811 = vmatprep.subr.mxu1 %v130_v49  ;;  %777 = vmatpush3.msra.mxu0 %v244_v50  ;;  %v188_v15 = vld [vmem:[#allocation8 + $0x268] sm:$0xff]  ;;  %v203_v17 = vld [vmem:[#allocation8 + $0x2e0] sm:$0xff]  ;;  %v170_v20 = vld [vmem:[#allocation8 + $0x1d8] sm:$0xff] }
  0x64   :  { %812 = vmatpush3.msra.mxu1 %v114_v51  ;;  %778 = vmatprep.subr.mxu0 %v259_v52  ;;  %v155_v18 = vld [vmem:[#allocation8 + $0x160] sm:$0xff]  ;;  %v202_v21 = vld [vmem:[#allocation8 + $0x2d8] sm:$0xff]  ;;  %v169_v24 = vld [vmem:[#allocation8 + $0x1d0] sm:$0xff] }
  0x65   :  { %813 = vmatprep.subr.mxu1 %v129_v53  ;;  %779 = vmatpush3.msra.mxu0 %v243_v54  ;;  %v187_v19 = vld [vmem:[#allocation8 + $0x260] sm:$0xff]  ;;  %v154_v22 = vld [vmem:[#allocation8 + $0x158] sm:$0xff]  ;;  %v201_v25 = vld [vmem:[#allocation8 + $0x2d0] sm:$0xff] }
  0x66   :  { %814 = vmatpush3.msra.mxu1 %v113_v55  ;;  %780 = vmatprep.subr.mxu0 %v258_v56  ;;  %v186_v23 = vld [vmem:[#allocation8 + $0x258] sm:$0xff]  ;;  %v153_v26 = vld [vmem:[#allocation8 + $0x150] sm:$0xff]  ;;  %v168_v28 = vld [vmem:[#allocation8 + $0x1c8] sm:$0xff] }
  0x67   :  { %815 = vmatprep.subr.mxu1 %v128_v57  ;;  %781 = vmatpush3.msra.mxu0 %v242_v58  ;;  %v185_v27 = vld [vmem:[#allocation8 + $0x250] sm:$0xff]  ;;  %v200_v29 = vld [vmem:[#allocation8 + $0x2c8] sm:$0xff]  ;;  %v167_v32 = vld [vmem:[#allocation8 + $0x1c0] sm:$0xff] }
  0x68   :  { %816 = vmatpush3.msra.mxu1 %v112_v59  ;;  %782 = vmatprep.subr.mxu0 %v257_v60  ;;  %v152_v30 = vld [vmem:[#allocation8 + $0x148] sm:$0xff]  ;;  %v199_v33 = vld [vmem:[#allocation8 + $0x2c0] sm:$0xff]  ;;  %v166_v36 = vld [vmem:[#allocation8 + $0x1b8] sm:$0xff] }
  0x69   :  { %817 = vmatprep.subr.mxu1 %v127_v61  ;;  %783 = vmatpush3.msra.mxu0 %v241_v62  ;;  %v184_v31 = vld [vmem:[#allocation8 + $0x248] sm:$0xff]  ;;  %v151_v34 = vld [vmem:[#allocation8 + $0x140] sm:$0xff]  ;;  %v198_v37 = vld [vmem:[#allocation8 + $0x2b8] sm:$0xff] }
  0x6a   :  { %337 = vmatprep.mubr.f32.mxu0 %v240_v63  ;;  %818 = vmatpush3.msra.mxu1 %v111_v0  ;;  %v183_v35 = vld [vmem:[#allocation8 + $0x240] sm:$0xff]  ;;  %v150_v38 = vld [vmem:[#allocation8 + $0x138] sm:$0xff]  ;;  %v165_v40 = vld [vmem:[#allocation8 + $0x1b0] sm:$0xff] }
  0x6b   :  { %407 = vmatprep.mubr.f32.mxu1 %v104_v1  ;;  %338 = vmatmul.mubr.f32.vlgmr.msra.gmra.mxu0 %v239_v2  ;;  %v182_v39 = vld [vmem:[#allocation8 + $0x238] sm:$0xff]  ;;  %v197_v41 = vld [vmem:[#allocation8 + $0x2b0] sm:$0xff]  ;;  %v164_v44 = vld [vmem:[#allocation8 + $0x1a8] sm:$0xff] }
  0x6c   :  { %408 = vmatmul.mubr.f32.vlgmr.msra.gmra.mxu1 %v103_v3  ;;  %822 = vmatprep.subr.mxu0 %v174_v4  ;;  %v149_v42 = vld [vmem:[#allocation8 + $0x130] sm:$0xff]  ;;  %v196_v45 = vld [vmem:[#allocation8 + $0x2a8] sm:$0xff]  ;;  %v163_v48 = vld [vmem:[#allocation8 + $0x1a0] sm:$0xff] }
  0x6d   :  { %857 = vmatprep.subr.mxu1 %v206_v5  ;;  %823 = vmatpush3.msra.mxu0 %v158_v6  ;;  %v181_v43 = vld [vmem:[#allocation8 + $0x230] sm:$0xff]  ;;  %v148_v46 = vld [vmem:[#allocation8 + $0x128] sm:$0xff]  ;;  %v195_v49 = vld [vmem:[#allocation8 + $0x2a0] sm:$0xff] }
  0x6e   :  { %858 = vmatpush3.msra.mxu1 %v190_v7  ;;  %824 = vmatprep.subr.mxu0 %v173_v8  ;;  %v180_v47 = vld [vmem:[#allocation8 + $0x228] sm:$0xff]  ;;  %v147_v50 = vld [vmem:[#allocation8 + $0x120] sm:$0xff]  ;;  %v162_v52 = vld [vmem:[#allocation8 + $0x198] sm:$0xff] }
  0x6f   :  { %859 = vmatprep.subr.mxu1 %v205_v9  ;;  %825 = vmatpush3.msra.mxu0 %v157_v10  ;;  %v179_v51 = vld [vmem:[#allocation8 + $0x220] sm:$0xff]  ;;  %v194_v53 = vld [vmem:[#allocation8 + $0x298] sm:$0xff]  ;;  %v161_v56 = vld [vmem:[#allocation8 + $0x190] sm:$0xff] }
  0x70   :  { %860 = vmatpush3.msra.mxu1 %v189_v11  ;;  %826 = vmatprep.subr.mxu0 %v172_v12  ;;  %v146_v54 = vld [vmem:[#allocation8 + $0x118] sm:$0xff]  ;;  %v193_v57 = vld [vmem:[#allocation8 + $0x290] sm:$0xff]  ;;  %v160_v60 = vld [vmem:[#allocation8 + $0x188] sm:$0xff] }
  0x71   :  { %861 = vmatprep.subr.mxu1 %v204_v13  ;;  %827 = vmatpush3.msra.mxu0 %v156_v14  ;;  %v178_v55 = vld [vmem:[#allocation8 + $0x218] sm:$0xff]  ;;  %v145_v58 = vld [vmem:[#allocation8 + $0x110] sm:$0xff]  ;;  %v192_v61 = vld [vmem:[#allocation8 + $0x288] sm:$0xff]  ;;  %v1148_v14 = vmov 0.0  }
  0x72   :  { %862 = vmatpush3.msra.mxu1 %v188_v15  ;;  %828 = vmatprep.subr.mxu0 %v171_v16  ;;  %v177_v59 = vld [vmem:[#allocation8 + $0x210] sm:$0xff]  ;;  %v144_v62 = vld [vmem:[#allocation8 + $0x108] sm:$0xff]  ;;  %v106_v63 = vld [vmem:[#allocation2 + $0x18] sm:$0xff] }
  0x73   :  { %863 = vmatprep.subr.mxu1 %v203_v17  ;;  %829 = vmatpush3.msra.mxu0 %v155_v18  ;;  %v159_v0 = vld [vmem:[#allocation8 + $0x180] sm:$0xff]  ;;  %v176_v1 = vld [vmem:[#allocation8 + $0x208] sm:$0xff]  ;;  %v105_v4 = vld [vmem:[#allocation2 + $0x10] sm:$0xff] }
  0x74   :  { %864 = vmatpush3.msra.mxu1 %v187_v19  ;;  %830 = vmatprep.subr.mxu0 %v170_v20  ;;  %v143_v2 = vld [vmem:[#allocation8 + $0x100] sm:$0xff]  ;;  %v238_v5 = vld [vmem:[#allocation8 + $0x3f8] sm:$0xff]  ;;  %v108_v7 = vld [vmem:[#allocation2 + $0x28] sm:$0xff] }
  0x75   :  { %865 = vmatprep.subr.mxu1 %v202_v21  ;;  %831 = vmatpush3.msra.mxu0 %v154_v22  ;;  %v191_v3 = vld [vmem:[#allocation8 + $0x280] sm:$0xff]  ;;  %v222_v8 = vld [vmem:[#allocation8 + $0x378] sm:$0xff]  ;;  %v107_v9 = vld [vmem:[#allocation2 + $0x20] sm:$0xff] }
  0x76   :  { %866 = vmatpush3.msra.mxu1 %v186_v23  ;;  %832 = vmatprep.subr.mxu0 %v169_v24  ;;  %v175_v6 = vld [vmem:[#allocation8 + $0x200] sm:$0xff]  ;;  %v237_v10 = vld [vmem:[#allocation8 + $0x3f0] sm:$0xff]  ;;  %v639_v12 = vld [vmem:[#allocation11 + $0x78] sm:$0xff] }
  0x77   :  { %867 = vmatprep.subr.mxu1 %v201_v25  ;;  %833 = vmatpush3.msra.mxu0 %v153_v26  ;;  %v221_v11 = vld [vmem:[#allocation8 + $0x370] sm:$0xff]  ;;  %v236_v13 = vld [vmem:[#allocation8 + $0x3e8] sm:$0xff]  ;;  %v235_v17 = vld [vmem:[#allocation8 + $0x3e0] sm:$0xff] }
  0x78   :  { %868 = vmatpush3.msra.mxu1 %v185_v27  ;;  %834 = vmatprep.subr.mxu0 %v168_v28  ;;  %v220_v15 = vld [vmem:[#allocation8 + $0x368] sm:$0xff]  ;;  %v638_v16 = vld [vmem:[#allocation11 + $0x70] sm:$0xff]  ;;  %v219_v18 = vld [vmem:[#allocation8 + $0x360] sm:$0xff] }
  0x79   :  { %869 = vmatprep.subr.mxu1 %v200_v29  ;;  %835 = vmatpush3.msra.mxu0 %v152_v30  ;;  %v637_v19 = vld [vmem:[#allocation11 + $0x68] sm:$0xff]  ;;  %v234_v20 = vld [vmem:[#allocation8 + $0x3d8] sm:$0xff]  ;;  %v636_v22 = vld [vmem:[#allocation11 + $0x60] sm:$0xff] }
  0x7a   :  { %870 = vmatpush3.msra.mxu1 %v184_v31  ;;  %836 = vmatprep.subr.mxu0 %v167_v32  ;;  %v218_v21 = vld [vmem:[#allocation8 + $0x358] sm:$0xff]  ;;  %v233_v23 = vld [vmem:[#allocation8 + $0x3d0] sm:$0xff]  ;;  %v232_v26 = vld [vmem:[#allocation8 + $0x3c8] sm:$0xff] }
  0x7b   :  { %871 = vmatprep.subr.mxu1 %v199_v33  ;;  %837 = vmatpush3.msra.mxu0 %v151_v34  ;;  %v217_v24 = vld [vmem:[#allocation8 + $0x350] sm:$0xff]  ;;  %v635_v25 = vld [vmem:[#allocation11 + $0x58] sm:$0xff]  ;;  %v216_v27 = vld [vmem:[#allocation8 + $0x348] sm:$0xff] }
  0x7c   :  { %872 = vmatpush3.msra.mxu1 %v183_v35  ;;  %838 = vmatprep.subr.mxu0 %v166_v36  ;;  %v634_v28 = vld [vmem:[#allocation11 + $0x50] sm:$0xff]  ;;  %v231_v29 = vld [vmem:[#allocation8 + $0x3c0] sm:$0xff]  ;;  %v633_v31 = vld [vmem:[#allocation11 + $0x48] sm:$0xff] }
  0x7d   :  { %873 = vmatprep.subr.mxu1 %v198_v37  ;;  %839 = vmatpush3.msra.mxu0 %v150_v38  ;;  %v215_v30 = vld [vmem:[#allocation8 + $0x340] sm:$0xff]  ;;  %v230_v32 = vld [vmem:[#allocation8 + $0x3b8] sm:$0xff]  ;;  %v229_v35 = vld [vmem:[#allocation8 + $0x3b0] sm:$0xff] }
  0x7e   :  { %874 = vmatpush3.msra.mxu1 %v182_v39  ;;  %840 = vmatprep.subr.mxu0 %v165_v40  ;;  %v214_v33 = vld [vmem:[#allocation8 + $0x338] sm:$0xff]  ;;  %v632_v34 = vld [vmem:[#allocation11 + $0x40] sm:$0xff]  ;;  %v213_v36 = vld [vmem:[#allocation8 + $0x330] sm:$0xff] }
  0x7f   :  { %875 = vmatprep.subr.mxu1 %v197_v41  ;;  %841 = vmatpush3.msra.mxu0 %v149_v42  ;;  %v631_v37 = vld [vmem:[#allocation11 + $0x38] sm:$0xff]  ;;  %v228_v38 = vld [vmem:[#allocation8 + $0x3a8] sm:$0xff]  ;;  %v630_v40 = vld [vmem:[#allocation11 + $0x30] sm:$0xff] }
  0x80   :  { %876 = vmatpush3.msra.mxu1 %v181_v43  ;;  %842 = vmatprep.subr.mxu0 %v164_v44  ;;  %v212_v39 = vld [vmem:[#allocation8 + $0x328] sm:$0xff]  ;;  %v227_v41 = vld [vmem:[#allocation8 + $0x3a0] sm:$0xff]  ;;  %v226_v44 = vld [vmem:[#allocation8 + $0x398] sm:$0xff] }
  0x81   :  { %877 = vmatprep.subr.mxu1 %v196_v45  ;;  %843 = vmatpush3.msra.mxu0 %v148_v46  ;;  %v211_v42 = vld [vmem:[#allocation8 + $0x320] sm:$0xff]  ;;  %v629_v43 = vld [vmem:[#allocation11 + $0x28] sm:$0xff]  ;;  %v210_v45 = vld [vmem:[#allocation8 + $0x318] sm:$0xff] }
  0x82   :  { %878 = vmatpush3.msra.mxu1 %v180_v47  ;;  %844 = vmatprep.subr.mxu0 %v163_v48  ;;  %v628_v46 = vld [vmem:[#allocation11 + $0x20] sm:$0xff]  ;;  %v225_v47 = vld [vmem:[#allocation8 + $0x390] sm:$0xff] }
  0x83   :  { %879 = vmatprep.subr.mxu1 %v195_v49  ;;  %845 = vmatpush3.msra.mxu0 %v147_v50  ;;  %v209_v48 = vld [vmem:[#allocation8 + $0x310] sm:$0xff]  ;;  %v627_v49 = vld [vmem:[#allocation11 + $0x18] sm:$0xff]  ;;  %v224_v50 = vld [vmem:[#allocation8 + $0x388] sm:$0xff] }
  0x84   :  { %880 = vmatpush3.msra.mxu1 %v179_v51  ;;  %846 = vmatprep.subr.mxu0 %v162_v52  ;;  %v208_v51 = vld [vmem:[#allocation8 + $0x308] sm:$0xff]  ;;  %v110_v52 = vld [vmem:[#allocation2 + $0x38] sm:$0xff] }
  0x85   :  { %881 = vmatprep.subr.mxu1 %v194_v53  ;;  %847 = vmatpush3.msra.mxu0 %v146_v54  ;;  %v223_v53 = vld [vmem:[#allocation8 + $0x380] sm:$0xff]  ;;  %v626_v54 = vld [vmem:[#allocation11 + $0x10] sm:$0xff] }
  0x86   :  { %882 = vmatpush3.msra.mxu1 %v178_v55  ;;  %848 = vmatprep.subr.mxu0 %v161_v56  ;;  %v207_v55 = vld [vmem:[#allocation8 + $0x300] sm:$0xff]  ;;  %v109_v56 = vld [vmem:[#allocation2 + $0x30] sm:$0xff] }
  0x87   :  { %883 = vmatprep.subr.mxu1 %v193_v57  ;;  %849 = vmatpush3.msra.mxu0 %v145_v58  ;;  %v625_v57 = vld [vmem:[#allocation11 + $0x8] sm:$0xff]  ;;  %v624_v58 = vld [vmem:[#allocation11] sm:$0xff] }
  0x88   :  { %884 = vmatpush3.msra.mxu1 %v177_v59  ;;  %850 = vmatprep.subr.mxu0 %v160_v60  ;;  %v623_v59 = vld [vmem:[#allocation7] sm:$0xff] }
  0x89   :  { %885 = vmatprep.subr.mxu1 %v192_v61  ;;  %851 = vmatpush3.msra.mxu0 %v144_v62 }
  0x8a   :  { %477 = vmatprep.mubr.f32.mxu0 %v106_v63  ;;  %852 = vmatprep.subr.mxu0 %v159_v0 }
  0x8b   :  { %886 = vmatpush3.msra.mxu1 %v176_v1  ;;  %853 = vmatpush3.msra.mxu0 %v143_v2 }
  0x8c   :  { %887 = vmatprep.subr.mxu1 %v191_v3  ;;  %478 = vmatmul.mubr.f32.vlgmr.msra.gmra.mxu0 %v105_v4 }
  0x8d   :  { %892 = vmatprep.subr.mxu0 %v238_v5  ;;  %888 = vmatpush3.msra.mxu1 %v175_v6 }
  0x8e   :  { %547 = vmatprep.mubr.f32.mxu1 %v108_v7  ;;  %893 = vmatpush3.msra.mxu0 %v222_v8 }
  0x8f   :  { %548 = vmatmul.mubr.f32.vlgmr.msra.gmra.mxu1 %v107_v9  ;;  %894 = vmatprep.subr.mxu0 %v237_v10 }
  0x90   :  { %944 = vmatprep.subr.mxu1 %v1148_v14  ;;  %895 = vmatpush3.msra.mxu0 %v221_v11 }
  0x91   :  { %945 = vmatpush3.msra.mxu1 %v639_v12  ;;  %896 = vmatprep.subr.mxu0 %v236_v13 }
  0x92   :  { %946 = vmatprep.subr.mxu1 %v1148_v14  ;;  %897 = vmatpush3.msra.mxu0 %v220_v15 }
  0x93   :  { %947 = vmatpush3.msra.mxu1 %v638_v16  ;;  %898 = vmatprep.subr.mxu0 %v235_v17 }
  0x94   :  { %948 = vmatprep.subr.mxu1 %v1148_v14  ;;  %899 = vmatpush3.msra.mxu0 %v219_v18 }
  0x95   :  { %949 = vmatpush3.msra.mxu1 %v637_v19  ;;  %900 = vmatprep.subr.mxu0 %v234_v20  ;;  %v751_v19 = vld [vmem:[%s1247_s6] ss:$0 sm:$0xff] }
  0x96   :  { %950 = vmatprep.subr.mxu1 %v1148_v14  ;;  %901 = vmatpush3.msra.mxu0 %v218_v21 }
  0x97   :  { %951 = vmatpush3.msra.mxu1 %v636_v22  ;;  %902 = vmatprep.subr.mxu0 %v233_v23  ;;  %v724_v22 = vlaneseq }
  0x98   :  { %952 = vmatprep.subr.mxu1 %v1148_v14  ;;  %903 = vmatpush3.msra.mxu0 %v217_v24 }
  0x99   :  { %953 = vmatpush3.msra.mxu1 %v635_v25  ;;  %904 = vmatprep.subr.mxu0 %v232_v26  ;;  %v725_v23 = vand.u32 127, %v724_v22  ;;  %v727_v24 = vshrl.u32 %v724_v22, 7 }
  0x9a   :  { %954 = vmatprep.subr.mxu1 %v1148_v14  ;;  %905 = vmatpush3.msra.mxu0 %v216_v27 }
  0x9b   :  { %955 = vmatpush3.msra.mxu1 %v634_v28  ;;  %906 = vmatprep.subr.mxu0 %v231_v29  ;;  %v728_v25 = vsub.s32 %v725_v23, %v727_v24 }
  0x9c   :  { %956 = vmatprep.subr.mxu1 %v1148_v14  ;;  %907 = vmatpush3.msra.mxu0 %v215_v30 }
  0x9d   :  { %957 = vmatpush3.msra.mxu1 %v633_v31  ;;  %908 = vmatprep.subr.mxu0 %v230_v32 }
  0x9e   :  { %958 = vmatprep.subr.mxu1 %v1148_v14  ;;  %909 = vmatpush3.msra.mxu0 %v214_v33 }
  0x9f   :  { %959 = vmatpush3.msra.mxu1 %v632_v34  ;;  %910 = vmatprep.subr.mxu0 %v229_v35 }
  0xa0   :  { %960 = vmatprep.subr.mxu1 %v1148_v14  ;;  %911 = vmatpush3.msra.mxu0 %v213_v36 }
  0xa1   :  { %961 = vmatpush3.msra.mxu1 %v631_v37  ;;  %912 = vmatprep.subr.mxu0 %v228_v38 }
  0xa2   :  { %962 = vmatprep.subr.mxu1 %v1148_v14  ;;  %913 = vmatpush3.msra.mxu0 %v212_v39 }
  0xa3   :  { %963 = vmatpush3.msra.mxu1 %v630_v40  ;;  %914 = vmatprep.subr.mxu0 %v227_v41 }
  0xa4   :  { %964 = vmatprep.subr.mxu1 %v1148_v14  ;;  %915 = vmatpush3.msra.mxu0 %v211_v42 }
  0xa5   :  { %965 = vmatpush3.msra.mxu1 %v629_v43  ;;  %916 = vmatprep.subr.mxu0 %v226_v44 }
  0xa6   :  { %966 = vmatprep.subr.mxu1 %v1148_v14  ;;  %917 = vmatpush3.msra.mxu0 %v210_v45 }
  0xa7   :  { %967 = vmatpush3.msra.mxu1 %v628_v46  ;;  %918 = vmatprep.subr.mxu0 %v225_v47 }
  0xa8   :  { %968 = vmatprep.subr.mxu1 %v1148_v14  ;;  %919 = vmatpush3.msra.mxu0 %v209_v48 }
  0xa9   :  { %969 = vmatpush3.msra.mxu1 %v627_v49  ;;  %920 = vmatprep.subr.mxu0 %v224_v50 }
  0xaa   :  { %970 = vmatprep.subr.mxu1 %v1148_v14  ;;  %921 = vmatpush3.msra.mxu0 %v208_v51 }
  0xab   :  { %617 = vmatprep.mubr.f32.mxu0 %v110_v52  ;;  %922 = vmatprep.subr.mxu0 %v223_v53 }
  0xac   :  { %971 = vmatpush3.msra.mxu1 %v626_v54  ;;  %923 = vmatpush3.msra.mxu0 %v207_v55 }
  0xad   :  { %972 = vmatprep.subr.mxu1 %v1148_v14  ;;  %618 = vmatmul.mubr.f32.vlgmr.msra.gmra.mxu0 %v109_v56 }
  0xae   :  { %973 = vmatpush3.msra.mxu1 %v625_v57  ;;  %976 = vmatprep.mubr.msk.f32.mxu1 %vm1149_vm0, %v1148_v14 }
  0xaf   :  { %974 = vmatprep.subr.mxu1 %v1148_v14 }
  0xb0   :  { %975 = vmatpush3.msra.mxu1 %v624_v58 }
  0xb1   :  { %977 = vmatmul.mubr.f32.vlgmr.msra.gmra.mxu1 %v623_v59 }
 0x12b   :  { %v784_v60 = vpop.f32.mrf.mxu0 }
 0x12c   :  { %v819_v61 = vpop.f32.mrf.mxu1 }
 0x12d   :  { %v785_v62 = vpop.f32.mrf.mxu0 }
 0x12e   :  { %v820_v0 = vpop.f32.mrf.mxu1  ;;  %v786_v3 = vadd.f32 %v785_v62, %v784_v60 }
 0x12f   :  { %v821_v4 = vadd.f32 %v820_v0, %v819_v61 }
 0x131   :  { %v410_v7 = vadd.f32 %v821_v4, %v786_v3 }
 0x14c   :  { %v854_v63 = vpop.f32.mrf.mxu0 }
 0x14e   :  { %v855_v1 = vpop.f32.mrf.mxu0 }
 0x14f   :  { %v889_v2 = vpop.f32.mrf.mxu1  ;;  %v856_v5 = vadd.f32 %v855_v1, %v854_v63 }
 0x151   :  { %v890_v6 = vpop.f32.mrf.mxu1  ;;  %v480_v8 = vadd.f32 %v856_v5, %v410_v7 }
 0x152   :  { %v891_v9 = vadd.f32 %v890_v6, %v889_v2 }
 0x154   :  { %v550_v12 = vadd.f32 %v891_v9, %v480_v8 }
 0x16d   :  { %v924_v10 = vpop.f32.mrf.mxu0 }
 0x16f   :  { %v925_v11 = vpop.f32.mrf.mxu0 }
 0x170   :  { %v926_v13 = vadd.f32 %v925_v11, %v924_v10 }
 0x171   :  { %v706_v14 = vpop.f32.mrf.mxu1 }
 0x172   :  { %v620_v15 = vadd.f32 %v926_v13, %v550_v12 }
 0x173   :  { %v978_v16 = vpop.f32.mrf.mxu1 }
 0x174   :  { %v710_v17 = vadd.f32 %v706_v14, %v620_v15 }
 0x176   :  { %v711_v18 = vmul.f32 0.2, %v710_v17 }
 0x178   :  { %v712_v20 = vmax.f32 %v710_v17, %v711_v18 }
 0x17a   :  { %v720_v21 = vmul.f32 %v751_v19, %v712_v20 }
 0x17c   :  { %721 = vadd.xlane.f32.xlu0 %v720_v21 }
 0x205   :  { %v722_v26 = vpop.xlane.xlu0 %721 }
 0x206   :  { %v729_v27 = vrot.slane %v722_v26, %v728_v25 }
 0x208   :  { %732 = vst.msk [vmem:[#allocation13] sm:$0x1] %vm731_vm1, %v729_v27 }
 0x209   :  { %1121 = shalt.err (!%p1118_p6)
}
 0x20a   :  { %742 = dma.vmem_to_hbm [thread:$0]  %s740_s30, 16, %s1248_s7, [#allocation4]  }
 0x20b   :  { %1138 = dma.done.wait [#allocation4], 16  }
 0x20c   :  { %1139 = vsyncadd [#allocation4], 4294967280 }
 0x20d   :  { %746 = vsyncpa [#allocation3], 1 }
 0x20e   :  { %747 = vsyncpa [#allocation6], 1 }
 0x20f   :  { %748 = vsyncpa [#allocation9], 1 }
 0x210   :  { %749 = vsyncpa [#allocation12], 1 }
 0x211   :  { %750 = vsyncpa [#allocation4], 1 }

</bundles_post_ra>
